<compile_context>
chip_gen: v6e
topology: v6e:2x2x1
jax: 0.10.0
libtpu: 0.0.40
codegen_flags: <defaults>
</compile_context>

<pallas_src>
import jax
import jax.numpy as jnp
from jax import lax
from jax.experimental import pallas as pl
from jax.experimental.pallas import tpu as pltpu


def _round_up(x: int, m: int) -> int:
    return ((x + m - 1) // m) * m


def _cdiv(a: int, b: int) -> int:
    return (a + b - 1) // b


def _linear_kernel(x_ref, w_ref, o_ref):
    # y_tile[tile_n, out_f] = x_tile[tile_n, K] @ w[out_f, K].T
    # Contract dim 1 of x against dim 1 of the PyTorch-layout weight directly;
    # fp32 accumulation on the MXU.
    o_ref[...] = lax.dot_general(
        x_ref[...],
        w_ref[...],
        dimension_numbers=(((1,), (1,)), ((), ())),
        preferred_element_type=jnp.float32,
    ).astype(o_ref.dtype)


# Max rows per tile: ~2 KiB VMEM per row double-buffered (lane-padded x + out
# blocks) -> 4096 rows ~= 8 MiB, safe under every generation's scoped default.
_MAX_TILE_ROWS = 4096


def linear_no_bias(x: jax.Array, w: jax.Array) -> jax.Array:
    """y = x @ w.T   (PyTorch nn.Linear(bias=False) semantics).

    x: (N, in_features)            float32
    w: (out_features, in_features) float32   -- PyTorch weight layout, NOT transposed
    """
    n, k = x.shape
    out_f, k2 = w.shape
    assert k == k2, (k, k2)

    # --- Row tiling -------------------------------------------------------
    # Keep the grid even and >= 2 (v7x megacore: both TCs share the HBM-bound
    # work), size tiles from the problem so tail padding is at most 7 rows per
    # tile, and cap tile size by the VMEM budget.
    num_tiles = max(2, _cdiv(n, _MAX_TILE_ROWS))
    if num_tiles % 2:
        num_tiles += 1
    tile_n = _round_up(_cdiv(n, num_tiles), 8)
    n_pad = tile_n * num_tiles

    x_p = x if n_pad == n else jnp.pad(x, ((0, n_pad - n), (0, 0)))

    grid = (num_tiles,)

    cost = pl.CostEstimate(
        flops=2 * n_pad * out_f * k,
        transcendentals=0,
        bytes_accessed=(n_pad * k + out_f * k + n_pad * out_f) * 4,
    )

    y_p = pl.pallas_call(
        _linear_kernel,
        out_shape=jax.ShapeDtypeStruct((n_pad, out_f), x.dtype),
        grid_spec=pltpu.PrefetchScalarGridSpec(
            num_scalar_prefetch=0,
            grid=grid,
            in_specs=[
                # x: walk the row tiles (last dim = full array dim -> legal).
                pl.BlockSpec((tile_n, k), lambda i: (i, 0)),
                # weight: same (full-array) block every step -> VMEM-resident,
                # DMA'd once.
                pl.BlockSpec((out_f, k), lambda i: (0, 0)),
            ],
            # Native out_f-wide output block (full last dim) -> contiguous HBM
            # writeback, no padded columns, no wrapper column slice.
            out_specs=pl.BlockSpec((tile_n, out_f), lambda i: (i, 0)),
        ),
        compiler_params=pltpu.CompilerParams(
            # Independent row tiles -> shard across TensorCores on v7x megacore.
            dimension_semantics=("parallel",),
        ),
        cost_estimate=cost,
    )(x_p, w)

    return y_p if n_pad == n else y_p[:n]


if __name__ == "__main__":
    h = 16                        # Submodule(h) -> Linear(4, 2*h, bias=False)
    in_features = 4
    out_features = 2 * h
    batch = 8                     # rows fed to the Linear (test-spec shape)

    key = jax.random.PRNGKey(0)
    kx, kw = jax.random.split(key)

    # Deterministic PyTorch-style init: U(-1/sqrt(fan_in), 1/sqrt(fan_in))
    bound = 1.0 / (in_features ** 0.5)
    w = jax.random.uniform(
        kw, (out_features, in_features), jnp.float32, minval=-bound, maxval=bound
    )
    x = jax.random.normal(kx, (batch, in_features), jnp.float32)

    # Small (test-spec) shape.
    y = linear_no_bias(x, w)
    jax.block_until_ready(y)
    y_ref = x @ w.T
    assert y.shape == (batch, out_features)
    assert jnp.allclose(y, y_ref, atol=1e-5, rtol=1e-5)

    # Larger batch to exercise the multi-step tiled / pipelined path.
    x_big = jax.random.normal(jax.random.PRNGKey(1), (4096, in_features), jnp.float32)
    y_big = linear_no_bias(x_big, w)
    jax.block_until_ready(y_big)
    assert y_big.shape == (4096, out_features)
    assert jnp.allclose(y_big, x_big @ w.T, atol=1e-5, rtol=1e-5)

    print("KERNEL_OK")
</pallas_src>

<mosaic_0001>
module attributes {stable_mosaic.version = 11 : i64} {
  func.func @_linear_kernel(%arg0: i32, %arg1: memref<8x4xf32, #tpu.memory_space<vmem>>, %arg2: memref<32x4xf32, #tpu.memory_space<vmem>>, %arg3: memref<8x32xf32, #tpu.memory_space<vmem>>) attributes {dimension_semantics = [#tpu.dimension_semantics<parallel>], iteration_bounds = array<i64: 2>, scalar_prefetch = 0 : i64, scratch_operands = 0 : i64, tpu.core_type = #tpu.core_type<tc>, window_params = [{transform_indices = @transform_0, window_bounds = array<i64: 8, 4>}, {pipeline_mode = #tpu.pipeline_mode<synchronous>, transform_indices = @transform_1, window_bounds = array<i64: 32, 4>}, {transform_indices = @transform_2, window_bounds = array<i64: 8, 32>}]} {
    %c0 = arith.constant 0 : index
    %c0_0 = arith.constant 0 : index
    %0 = vector.load %arg1[%c0, %c0_0] : memref<8x4xf32, #tpu.memory_space<vmem>>, vector<8x4xf32>
    %c0_1 = arith.constant 0 : index
    %c0_2 = arith.constant 0 : index
    %1 = vector.load %arg2[%c0_1, %c0_2] : memref<32x4xf32, #tpu.memory_space<vmem>>, vector<32x4xf32>
    %cst = arith.constant dense<0.000000e+00> : vector<8x32xf32>
    %2 = tpu.matmul %0, %1, %cst {dimension_numbers = #tpu.dot_dimension_numbers<[1], [1], [0], [0], [0, 0, 1, 0], [], []>} : vector<8x4xf32>, vector<32x4xf32>, vector<8x32xf32> -> vector<8x32xf32>
    %c0_3 = arith.constant 0 : index
    %c0_4 = arith.constant 0 : index
    %3 = vector.load %arg3[%c0_3, %c0_4] : memref<8x32xf32, #tpu.memory_space<vmem>>, vector<8x32xf32>
    tpu.vector_store %arg3[%c0_3, %c0_4], %2 {strides = array<i32>} : memref<8x32xf32, #tpu.memory_space<vmem>>, vector<8x32xf32>,
    return
  }
  func.func @transform_0(%arg0: i32) -> (i32, i32) {
    %c0_i32 = arith.constant 0 : i32
    %c0_i32_0 = arith.constant 0 : i32
    return %arg0, %c0_i32 : i32, i32
  }
  func.func @transform_1(%arg0: i32) -> (i32, i32) {
    %c0_i32 = arith.constant 0 : i32
    %c0_i32_0 = arith.constant 0 : i32
    %c0_i32_1 = arith.constant 0 : i32
    return %c0_i32, %c0_i32_0 : i32, i32
  }
  func.func @transform_2(%arg0: i32) -> (i32, i32) {
    %c0_i32 = arith.constant 0 : i32
    %c0_i32_0 = arith.constant 0 : i32
    return %arg0, %c0_i32 : i32, i32
  }
}

</mosaic_0001>

<bundles_post_ra>
// kernel: tpu_custom_call.1
= control target key start
LH: loop header
LB: loop body
LE: loop exit
PB: predicated region body
PF: predicated region fallthrough
CT: control target
= control target key end

     0   :  { %7 = vsyncpa [#allocation3], 0  ;;  %s573_s0 = inlined_call_operand.vmem [shape: f32[16,4], index: 0, kind: input, shape index: {}]   ;;  %s574_s1 = inlined_call_operand.vmem [shape: f32[32,4], index: 1, kind: input, shape index: {}]   ;;  %s575_s2 = inlined_call_operand.hbm [shape: f32[16,32], index: 2, kind: output, shape index: {}]  }
   0x1   :  { %9 = vsyncpa [#allocation3 + $0x1], 0  ;;  %s457_s9 = smov 0   ;;  %s459_s10 = smov 0  }
   0x2   :  { %s461_s11 = smov 0   ;;  %s463_s12 = smov 0  }
   0x3 LB: > { %s478_s13 = sadd.s32 4294967295, %s437_s12   ;;  %s305_s14 = sadd.s32 4294967294, %s437_s12   ;;  %s437_s12 = sphi %s463_s12, %s581_s12   ;;  %s433_s11 = sphi %s461_s11, %s580_s11   ;;  %s429_s10 = sphi %s459_s10, %s579_s10   ;;  %s425_s9 = sphi %s457_s9, %s578_s9  }
   0x4   : > { %s482_s15 = sadd.s32 1, %s437_s12   ;;  %s69_s16 = sadd.s32 1, %s433_s11 }
   0x5   : > { %s66_s17 = ssub.s32 %s437_s12, %s482_s15  ;;  %p79_p0 = scmp.ne.s32.totalorder %s433_s11, %s429_s10 }
   0x6   : > { %p67_p1 = scmp.eq.s32.totalorder %s66_s17, 0  ;;  %p80_p2 = scmp.eq.s32.totalorder %s478_s13, 1 }
   0x7   : > { %p85_p3 = scmp.ne.s32.totalorder %s429_s10, %s425_s9  ;;  %p86_p4 = scmp.eq.s32.totalorder %s305_s14, 1 }
   0x8   : > { %s493_s18 = scalar_select %p67_p1, %s433_s11, %s69_s16  }
   0x9   : > { %p495_p5 = por %p80_p2, %p79_p0  ;;  %p499_p6 = por %p86_p4, %p85_p3 }
   0xa   : > { %p308_p7 = scmp.ge.s32.totalorder %s437_s12, 1  ;;  %p114_p8 = scmp.lt.s32.totalorder %s437_s12, 3 }
   0xc   : > { %p115_p9 = pnand %p308_p7, %p114_p8 }
   0xd   : > { %p135_p10 = scmp.lt.s32.totalorder (!%p115_p9), %s478_s13, 1  ;;  %s132_s6 = sand.u32 (!%p115_p9), 1, %s429_s10  }
   0xe   : > { %118 = sbr.rel (%p115_p9) target bundleno = 243 (0xf3), region = 28  ;;  %s309_s7 = sshll.u32 (!%p115_p9), %s132_s6, 3 }
   0xf   : > { %s317_s8 = sshll.u32 (!%p115_p9), %s478_s13, 7  ;;  %s134_s14 = scalar_lea.vmem (!%p115_p9), [#allocation2], %s309_s7 }
  0x10   : > { %s246_s16 = sshll.u32 (!%p115_p9), %s134_s14, 4  ;;  %s532_s22 = scalar_lea.hbm (!%p115_p9), %s575_s2, %s317_s8  ;;  %s534_s16 = int_to_ptr.vmem [resolvable:$true] %s246_s16 }
  0x11   : > { %s233_s23 = scalar_lea.sflag (!%p115_p9), [#allocation3], %s132_s6  ;;  %s377_s24 = scalar_lea.vmem (!%p115_p9), %s534_s16, 128 }
  0x12   : > { %p378_p11 = scmp.ne.s32.totalorder (!%p115_p9), %s534_s16, %s377_s24 }
  0x13   : > { %v143_v0 = vld [vmem:[%s574_s1 + $0x18] sm:$0xff]  ;;  %vm144_vm0 = vcmask 31744   ;;  %v439_v1 = vmov 0.0   ;;  %vm440_vm1 = vmmov 0   ;;  %v142_v2 = vld [vmem:[%s574_s1 + $0x10] sm:$0xff]  ;;  %s136_s25 = scalar_select %p135_p10, %s478_s13, 1 }
  0x14   : > { %325 = vmatprep.subr.mxu0 %v439_v1  ;;  %333 = vmatprep.mubr.msk.f32.mxu0 %vm440_vm1, %v439_v1  ;;  %v141_v3 = vld [vmem:[%s574_s1 + $0x8] sm:$0xff]  ;;  %v140_v4 = vld [vmem:[%s574_s1] sm:$0xff]  ;;  %vm230_vm2 = vcmask 261120   ;;  %p379_p12 = pnand %p378_p11, %p495_p5  ;;  %s441_s13 = smov [#allocation2]  }
  0x15   : > { %326 = vmatpush3.xpose.msk.msra.mxu0 %vm144_vm0, %v143_v0  ;;  %s310_s28 = sshll.u32 %s136_s25, 3  ;;  %s381_s25 = sshll.u32 %s441_s13, 4  ;;  %s382_s25 = int_to_ptr.vmem [resolvable:$false] %s381_s25 }
  0x16   : > { %327 = vmatprep.subr.mxu0 %v439_v1  ;;  %s138_s5 = scalar_lea.vmem %s573_s0, %s310_s28  ;;  %p380_p13 = pneg %p379_p12 }
  0x17   : > { %v139_v5 = vld [vmem:[%s138_s5] sm:$0xff]  ;;  %s383_s26 = scalar_lea.vmem %s382_s25, 256  ;;  %p384_p0 = scmp.lt.s32.totalorder %s534_s16, %s382_s25 }
  0x18   : > { %p385_p1 = scmp.lt.s32.totalorder %s383_s26, %s377_s24 }
  0x19   : > { %328 = vmatpush3.xpose.msk.msra.mxu0 %vm144_vm0, %v142_v2 }
  0x1a   : > { %329 = vmatprep.subr.mxu0 %v439_v1  ;;  %p386_p2 = por %p385_p1, %p384_p0 }
  0x1c   : > { %p387_p3 = pnand %p386_p2, %p380_p13 }
  0x1d   : > { %330 = vmatpush3.xpose.msk.msra.mxu0 %vm144_vm0, %v141_v3 }
  0x1e   : > { %331 = vmatprep.subr.mxu0 %v439_v1 }
  0x21   : > { %332 = vmatpush3.xpose.msk.msra.mxu0 %vm144_vm0, %v140_v4 }
  0x24   : > { %334 = vmatmul.mubr.msk.f32.vlgmr.msra.gmra.mxu0 %vm144_vm0, %v139_v5 }
  0xe4   : > { %v226_v6 = vpop.f32.mrf.mxu0 }
  0xe5   : > { %231 = vst.msk [vmem:[%s134_s14] sm:$0xff] %vm230_vm2, %v226_v6 }
  0xe6   : > { %v335_v7 = vpop.f32.mrf.mxu0 }
  0xe7   : > { %390 = shalt.err (!%p387_p3)
}
  0xe8   : > { %s391_s27 = scalar_lea.hbm %s532_s22, 128  ;;  %s395_s30 = scalar_lea.hbm %s575_s2, 256 }
  0xe9   : > { %p392_p4 = scmp.ne.s32.totalorder %s532_s22, %s391_s27  ;;  %p396_p9 = scmp.lt.s32.totalorder %s532_s22, %s575_s2 }
  0xea   : > { %p397_p10 = scmp.lt.s32.totalorder %s395_s30, %s391_s27 }
  0xeb   : > { %p393_p7 = pnand %p392_p4, %p495_p5 }
  0xec   : > { %p398_p11 = por %p397_p10, %p396_p9 }
  0xed   : > { %p394_p8 = pneg %p393_p7 }
  0xef   : > { %p399_p12 = pnand %p398_p11, %p394_p8 }
  0xf1   : > { %402 = shalt.err (!%p399_p12)
}
  0xf2   : > { %336 = dma.vmem_to_hbm [thread:$0]  (%p495_p5), %s534_s16, 128, %s532_s22, %s233_s23  }
  0xf3 PF: > { %p342_p13 = scmp.ge.s32.totalorder %s437_s12, 2  ;;  %s258_s5 = sand.u32 1, %s425_s9  }
  0xf4   : > { %s259_s6 = scalar_lea.sflag [#allocation3], %s258_s5 }
  0xf5   : > { %p339_p0 = pnand %p342_p13, %p499_p6 }
  0xf7   : > { %p340_p1 = pneg %p339_p0 }
  0xf9   : > { %420 = dma.done.wait (%p340_p1), %s259_s6, 128  }
  0xfa   : > { %422 = vsyncadd (%p340_p1), %s259_s6, 4294967168  ;;  %p12_p2 = scmp.ge.s32.totalorder %s482_s15, 4   ;;  %s578_s9 = smov %s429_s10 }
  0xfb   : > { %s579_s10 = smov %s433_s11  ;;  %s580_s11 = smov %s493_s18 }
  0xfc   : > { %s581_s12 = smov %s482_s15  ;;  %14 = sbr.rel (!%p12_p2) target bundleno = 3 (0x3), region = 63 }
 0x101   :  { %264 = vsyncpa [#allocation3], 1 }
 0x102   :  { %266 = vsyncpa [#allocation3 + $0x1], 1 }

</bundles_post_ra>
